<compile_context>
chip_gen: v7x
topology: tpu7x:2x2x1
jax: 0.10.0
libtpu: 0.0.40
codegen_flags: <defaults>
</compile_context>

<pallas_src>
import jax
import jax.numpy as jnp
from jax.experimental import pallas as pl
from jax.experimental.pallas import tpu as pltpu


def _locked_drop_kernel(mask_ref, x_ref, o_ref):
    # mask_ref: (1, tile_w) keep-mask already scaled by 1/(1-p), in x.dtype.
    # x_ref / o_ref: (tile_t, tile_w) time-major slab; mask broadcasts over rows.
    o_ref[...] = x_ref[...] * mask_ref[...]


def _make_locked_mask(seed, B, H, keep_prob, dtype):
    """The single 'locked' (B, H) mask, pre-scaled by 1/keep_prob."""
    key = jax.random.PRNGKey(seed)
    keep = jax.random.bernoulli(key, p=keep_prob, shape=(B, H))
    return (keep.astype(jnp.float32) * jnp.float32(1.0 / keep_prob)).astype(dtype)


def _vmem_capacity_bytes():
    """Physical VMEM of the current chip (fallback: v7x's 64 MiB, the smallest)."""
    try:
        return int(pltpu.get_tpu_info().vmem_capacity_bytes)
    except Exception:
        return 64 << 20


def _choose_tiles(T, W, itemsize):
    """Generation-aware 2-D tile selection for the (T, W) streamed slab.

    Live VMEM = 2x x-tile + 2x out-tile (double-buffered) + 2x mask row (tiny).
    Block target is derived from the chip's VMEM capacity so one code path fits
    v5e/v6e (128 MiB) and v7x (64 MiB), and blocks stay bounded no matter how
    wide B*H is.  Returns (tile_t, tile_w, vmem_limit_bytes).
    """
    vmem_cap = _vmem_capacity_bytes()
    budget = min(vmem_cap // 2, 40 << 20)                 # total live-buffer budget
    block_target = max(1 << 20, min(8 << 20, budget // 5))  # ~6.4 MiB v7x, 8 MiB v5e/v6e
    vmem_limit = int(min(vmem_cap * 3 // 4, budget + (8 << 20)))

    # Lane (width) tile: full width if an 8-row slab fits the target, otherwise
    # the largest multiple of 128 that does (second grid axis kicks in).
    lanes = max(1, block_target // (8 * 128 * itemsize))
    tile_w = int(min(W, lanes * 128))

    # Sublane (time) tile: fill the block target, in multiples of 8.
    rows = max(8, (block_target // (tile_w * itemsize)) // 8 * 8)
    tile_t = int(min(T, rows))
    if T >= 16:
        # Guarantee >= 2 grid steps along T so both v7x TensorCores stream.
        tile_t = min(tile_t, max(8, (((T + 1) // 2) // 8) * 8))
    return tile_t, tile_w, vmem_limit


def locked_drop(x, seed, dropout=0.5, training=True):
    """JAX wrapper reproducing LockedDrop.forward for x of shape (T, B, H)."""
    if not training or not dropout:
        return x

    keep_prob = 1.0 - float(dropout)
    T, B, H = x.shape
    BH = B * H
    itemsize = x.dtype.itemsize

    # Lane-dense layout: (T, B, H) -> (T, BH), padded to a 128-lane multiple so
    # the kernel's stores are full-width.  Free when BH % 128 == 0.
    W = ((BH + 127) // 128) * 128

    mask = _make_locked_mask(seed, B, H, keep_prob, x.dtype).reshape(1, BH)
    x2 = x.reshape(T, BH)
    if W != BH:
        pad = W - BH
        mask = jnp.pad(mask, ((0, 0), (0, pad)))
        x2 = jnp.pad(x2, ((0, 0), (0, pad)))

    tile_t, tile_w, vmem_limit = _choose_tiles(T, W, itemsize)
    grid = (pl.cdiv(T, tile_t), pl.cdiv(W, tile_w))

    out = pl.pallas_call(
        _locked_drop_kernel,
        out_shape=jax.ShapeDtypeStruct((T, W), x.dtype),
        grid=grid,
        in_specs=[
            pl.BlockSpec((1, tile_w), lambda t, w: (0, w)),        # locked mask (resident over T)
            pl.BlockSpec((tile_t, tile_w), lambda t, w: (t, w)),   # streamed x tile
        ],
        out_specs=pl.BlockSpec((tile_t, tile_w), lambda t, w: (t, w)),
        compiler_params=pltpu.CompilerParams(
            dimension_semantics=("parallel", "parallel"),          # both TCs on v7x
            vmem_limit_bytes=vmem_limit),
        cost_estimate=pl.CostEstimate(
            flops=T * W,
            transcendentals=0,
            bytes_accessed=(2 * T * W + W) * itemsize),
    )(mask, x2)

    if W != BH:
        out = out[:, :BH]
    return out.reshape(T, B, H)


if __name__ == "__main__":
    key = jax.random.PRNGKey(0)
    T, B, H = 8, 2, 32                      # seq=8, batch=2, hidden=32
    x = jax.random.normal(key, (T, B, H), dtype=jnp.float32)

    dropout, seed = 0.5, 0
    y = jax.block_until_ready(locked_drop(x, seed=seed, dropout=dropout, training=True))
    assert y.shape == x.shape and y.dtype == x.dtype

    # Exact reference: same mask the wrapper samples, broadcast over T.
    mask = _make_locked_mask(seed, B, H, 1.0 - dropout, x.dtype)
    y_ref = x * mask[None, :, :]
    assert bool(jnp.allclose(y, y_ref, rtol=1e-6, atol=1e-6))

    # Locked property: dropped (B, H) positions are zero for EVERY time step,
    # kept positions are exactly x / (1 - dropout).
    dropped = (mask == 0.0)[None, :, :]
    assert bool(jnp.all(jnp.where(dropped, y == 0.0, True)))
    assert bool(jnp.allclose(jnp.where(dropped, 0.0, y),
                             jnp.where(dropped, 0.0, x / (1.0 - dropout)),
                             rtol=1e-6, atol=1e-6))

    # Eval mode is identity.
    y_eval = jax.block_until_ready(locked_drop(x, seed=seed, dropout=dropout, training=False))
    assert bool(jnp.all(y_eval == x))

    print("KERNEL_OK")
</pallas_src>

<mosaic_0001>
module attributes {stable_mosaic.version = 11 : i64} {
  func.func @_locked_drop_kernel(%arg0: i32, %arg1: i32, %arg2: memref<1x128xf32, #tpu.memory_space<vmem>>, %arg3: memref<8x128xf32, #tpu.memory_space<vmem>>, %arg4: memref<8x128xf32, #tpu.memory_space<vmem>>) attributes {dimension_semantics = [#tpu.dimension_semantics<parallel>, #tpu.dimension_semantics<parallel>], iteration_bounds = array<i64: 1, 1>, scalar_prefetch = 0 : i64, scratch_operands = 0 : i64, tpu.core_type = #tpu.core_type<tc>, window_params = [{transform_indices = @transform_0, window_bounds = array<i64: 1, 128>}, {transform_indices = @transform_1, window_bounds = array<i64: 8, 128>}, {transform_indices = @transform_2, window_bounds = array<i64: 8, 128>}]} {
    %c0 = arith.constant 0 : index
    %c0_0 = arith.constant 0 : index
    %0 = vector.load %arg3[%c0, %c0_0] : memref<8x128xf32, #tpu.memory_space<vmem>>, vector<8x128xf32>
    %c0_1 = arith.constant 0 : index
    %c0_2 = arith.constant 0 : index
    %1 = vector.load %arg2[%c0_1, %c0_2] : memref<1x128xf32, #tpu.memory_space<vmem>>, vector<1x128xf32>
    %2 = vector.broadcast %1 : vector<1x128xf32> to vector<8x128xf32>
    %3 = arith.mulf %0, %2 : vector<8x128xf32>
    %c0_3 = arith.constant 0 : index
    %c0_4 = arith.constant 0 : index
    %4 = vector.load %arg4[%c0_3, %c0_4] : memref<8x128xf32, #tpu.memory_space<vmem>>, vector<8x128xf32>
    tpu.vector_store %arg4[%c0_3, %c0_4], %3 {strides = array<i32>} : memref<8x128xf32, #tpu.memory_space<vmem>>, vector<8x128xf32>,
    return
  }
  func.func @transform_0(%arg0: i32, %arg1: i32) -> (i32, i32) {
    %c0_i32 = arith.constant 0 : i32
    %c0_i32_0 = arith.constant 0 : i32
    return %c0_i32, %arg1 : i32, i32
  }
  func.func @transform_1(%arg0: i32, %arg1: i32) -> (i32, i32) {
    %c0_i32 = arith.constant 0 : i32
    return %arg0, %arg1 : i32, i32
  }
  func.func @transform_2(%arg0: i32, %arg1: i32) -> (i32, i32) {
    %c0_i32 = arith.constant 0 : i32
    return %arg0, %arg1 : i32, i32
  }
}

</mosaic_0001>

<bundles_post_ra>
// kernel: tpu_custom_call.1
= control target key start
LH: loop header
LB: loop body
LE: loop exit
PB: predicated region body
PF: predicated region fallthrough
CT: control target
= control target key end

     0   :  { %7 = vsyncpa [#allocation3], 0  ;;  %s192_s0 = inlined_call_operand.hbm [shape: f32[1,128], index: 0, kind: input, shape index: {}]   ;;  %s193_s1 = inlined_call_operand.hbm [shape: f32[8,128], index: 1, kind: input, shape index: {}]   ;;  %s194_s2 = inlined_call_operand.hbm [shape: f32[8,128], index: 2, kind: output, shape index: {}]  }
   0x1   :  { %8 = vsyncpa [#allocation6], 0 }
   0x2   :  { %9 = vsyncpa [#allocation4], 0  ;;  %s138_s9 = smov [#allocation2]   ;;  %s139_s11 = smov [#allocation5]  }
   0x3   :  { %s16_s10 = sshll.u32 %s138_s9, 4  ;;  %s26_s12 = sshll.u32 %s139_s11, 4  ;;  %s17_s10 = int_to_ptr.vmem [resolvable:$true] %s16_s10  ;;  %s27_s12 = int_to_ptr.vmem [resolvable:$true] %s26_s12 }
   0x4   :  { %s66_s15 = scalar_lea.hbm %s192_s0, 16 }
   0x5   :  { %p67_p0 = scmp.ne.s32.totalorder %s192_s0, %s66_s15  ;;  %p70_p1 = scmp.lt.u32.totalorder %s66_s15, %s192_s0 }
   0x7   :  { %p72_p2 = pnand %p70_p1, %p67_p0 }
   0x9   :  { %75 = shalt.err (!%p72_p2)
}
   0xa   :  { %s76_s20 = scalar_lea.vmem %s17_s10, 16  ;;  %s80_s21 = scalar_lea.vmem %s17_s10, 32 }
   0xb   :  { %p77_p3 = scmp.ne.s32.totalorder %s17_s10, %s76_s20  ;;  %p81_p4 = scmp.lt.s32.totalorder %s17_s10, %s17_s10 }
   0xc   :  { %p82_p5 = scmp.lt.s32.totalorder %s80_s21, %s76_s20 }
   0xe   :  { %p83_p6 = por %p82_p5, %p81_p4 }
  0x10   :  { %p84_p7 = pnand %p83_p6, %p77_p3 }
  0x12   :  { %87 = shalt.err (!%p84_p7)
}
  0x13   :  { %19 = dma.hbm_to_vmem [thread:$0]  %s192_s0, 16, %s17_s10, [#allocation3]  }
  0x14   :  { %s88_s26 = scalar_lea.hbm %s193_s1, 128 }
  0x15   :  { %p89_p8 = scmp.ne.s32.totalorder %s193_s1, %s88_s26  ;;  %p92_p9 = scmp.lt.u32.totalorder %s88_s26, %s193_s1 }
  0x17   :  { %p94_p10 = pnand %p92_p9, %p89_p8 }
  0x19   :  { %97 = shalt.err (!%p94_p10)
}
  0x1a   :  { %s98_s3 = scalar_lea.vmem %s27_s12, 128  ;;  %p103_p12 = scmp.lt.s32.totalorder %s27_s12, %s27_s12 }
  0x1b   :  { %p99_p11 = scmp.ne.s32.totalorder %s27_s12, %s98_s3  ;;  %p104_p13 = scmp.lt.s32.totalorder %s98_s3, %s98_s3 }
  0x1d   :  { %p105_p0 = por %p104_p13, %p103_p12 }
  0x1f   :  { %p106_p1 = pnand %p105_p0, %p99_p11 }
  0x21   :  { %109 = shalt.err (!%p106_p1)
}
  0x22   :  { %29 = dma.hbm_to_vmem [thread:$0]  %s193_s1, 128, %s27_s12, [#allocation6]  }
  0x23   :  { %132 = dma.done.wait [#allocation3], 16  }
  0x24   :  { %133 = vsyncadd [#allocation3], 4294967280 }
  0x25   :  { %134 = dma.done.wait [#allocation6], 128  }
  0x26   :  { %135 = vsyncadd [#allocation6], 4294967168  ;;  %s140_s5 = smov [#allocation7]   ;;  %v36_v0 = vld [vmem:[#allocation5] sm:$0xff]  ;;  %v62_v1 = vld [vmem:[#allocation2] ss:$0 sm:$0xff] }
  0x27   :  { %s52_s6 = sshll.u32 %s140_s5, 4  ;;  %v44_v2 = vmul.f32 %v62_v1, %v36_v0  ;;  %s53_s6 = int_to_ptr.vmem [resolvable:$true] %s52_s6 }
  0x28   :  { %s110_s7 = scalar_lea.vmem %s53_s6, 128  ;;  %p115_p3 = scmp.lt.s32.totalorder %s53_s6, %s53_s6 }
  0x29   :  { %45 = vst [vmem:[#allocation7] sm:$0xff] %v44_v2  ;;  %p111_p2 = scmp.ne.s32.totalorder %s53_s6, %s110_s7  ;;  %p116_p4 = scmp.lt.s32.totalorder %s110_s7, %s110_s7 }
  0x2b   :  { %p117_p5 = por %p116_p4, %p115_p3 }
  0x2d   :  { %p118_p6 = pnand %p117_p5, %p111_p2 }
  0x2f   :  { %121 = shalt.err (!%p118_p6)
}
  0x30   :  { %s122_s9 = scalar_lea.hbm %s194_s2, 128 }
  0x31   :  { %p123_p7 = scmp.ne.s32.totalorder %s194_s2, %s122_s9  ;;  %p126_p8 = scmp.lt.u32.totalorder %s122_s9, %s194_s2 }
  0x33   :  { %p128_p9 = pnand %p126_p8, %p123_p7 }
  0x35   :  { %131 = shalt.err (!%p128_p9)
}
  0x36   :  { %55 = dma.vmem_to_hbm [thread:$0]  %s53_s6, 128, %s194_s2, [#allocation4]  }
  0x37   :  { %136 = dma.done.wait [#allocation4], 128  }
  0x38   :  { %137 = vsyncadd [#allocation4], 4294967168 }
  0x39   :  { %59 = vsyncpa [#allocation3], 1 }
  0x3a   :  { %60 = vsyncpa [#allocation6], 1 }
  0x3b   :  { %61 = vsyncpa [#allocation4], 1 }

</bundles_post_ra>
